<compile_context>
chip_gen: v6e
topology: v6e:2x2x1
jax: 0.10.0
libtpu: 0.0.40
codegen_flags: <defaults>
</compile_context>

<pallas_src>
import math
import functools

import numpy as np
import jax
import jax.numpy as jnp
from jax.experimental import pallas as pl
from jax.experimental.pallas import tpu as pltpu


def _round_up(x, m):
    return ((x + m - 1) // m) * m


def _vmem_capacity_bytes():
    try:
        return int(pltpu.get_tpu_info().vmem_capacity_bytes)
    except Exception:
        return 128 << 20  # v5e/v6e default if the query is unavailable


def _footprint_bytes(tm, tk, dim_p, w_isz, out_isz):
    """Approximate VMEM footprint of one pipelined step (double-buffered inputs/outputs)."""
    return (2 * tm * dim_p * w_isz          # x tiles
            + 2 * dim_p * tk * w_isz        # W1 chunk buffers
            + 2 * tk * dim_p * w_isz        # W2 chunk buffers
            + 2 * 8 * tk * 4                # b1 (1 row pads to 8 sublanes)
            + 2 * 8 * dim_p * 4             # b2
            + 2 * tm * dim_p * out_isz      # output tiles
            + tm * dim_p * 4                # f32 accumulator scratch
            + tm * tk * (4 + w_isz))        # f32 hidden intermediate + cast copy


def _select_tiles(M, dim_p, hid_p, w_isz, out_isz):
    """Generation-aware (tm, tk, budget, small_vmem) selection."""
    vmem_cap = _vmem_capacity_bytes()
    small_vmem = vmem_cap <= (64 << 20)                 # v7x-like: 64 MiB per TensorCore
    budget = (52 << 20) if small_vmem else (100 << 20)  # leave headroom for Mosaic scratch
    tm_cap = 512 if small_vmem else (1024 if w_isz <= 2 else 512)

    m_req = max(16, _round_up(M, 16))
    tm_candidates = [t for t in (1024, 768, 640, 512, 384, 256, 128, 64, 32, 16) if t <= tm_cap]

    def pick(tk, tm_floor):
        tk = min(tk, hid_p)
        floor = min(tm_floor, m_req)
        for tm in tm_candidates:
            tm_e = min(tm, m_req)
            if tm_e < floor:
                continue
            if _footprint_bytes(tm_e, tk, dim_p, w_isz, out_isz) <= budget:
                return tm_e, tk
        return None

    # Preference order: weight-resident first (weights DMA'd exactly once), then streamed
    # hidden chunks; on small-VMEM chips shrink tk before tm to stay compute-bound.
    prefs = [(hid_p, 256)]
    if small_vmem:
        prefs += [(512, 384), (256, 384), (256, 256), (256, 128), (128, 128), (128, 16)]
    else:
        prefs += [(512, 256), (512, 128), (256, 64), (128, 16)]

    choice = None
    for tk, tm_floor in prefs:
        choice = pick(tk, tm_floor)
        if choice is not None:
            break
    if choice is None:
        choice = (min(16, m_req), min(128, hid_p))
    tm_eff, tk_eff = choice

    # 2-TensorCore chips: make sure the parallel token axis has >= 2 steps when possible.
    if small_vmem and tm_eff >= M and M > 16:
        tm_eff = max(16, _round_up((M + 1) // 2, 16))

    return tm_eff, tk_eff, budget, small_vmem


def _ffn_kernel(x_ref, w1_ref, b1_ref, w2_ref, b2_ref, o_ref, acc_ref, *, approximate_gelu):
    """One (token-tile i, hidden-chunk k) step of x@W1+b1 -> GELU -> @W2 (+b2 on last k)."""
    k = pl.program_id(1)

    @pl.when(k == 0)
    def _():
        acc_ref[...] = jnp.zeros_like(acc_ref)

    # First matmul: (tm, dim) @ (dim, tk) in native operand dtype, f32 accumulation on the MXU.
    h = jnp.dot(x_ref[...], w1_ref[...], preferred_element_type=jnp.float32)
    h = h + b1_ref[...].astype(jnp.float32)

    if approximate_gelu:
        # tanh form -> EUP slot (cheap); slightly different numerics from torch's default.
        h = jax.nn.gelu(h, approximate=True)
    else:
        # Exact GELU (erf formulation) — matches torch.nn.GELU default.
        h = 0.5 * h * (1.0 + jax.lax.erf(h * (1.0 / math.sqrt(2.0))))

    # Second matmul: accumulate this hidden chunk's contribution: (tm, tk) @ (tk, dim).
    acc_ref[...] += jnp.dot(h.astype(w2_ref.dtype), w2_ref[...],
                            preferred_element_type=jnp.float32)

    @pl.when(k == pl.num_programs(1) - 1)
    def _():
        o_ref[...] = (acc_ref[...] + b2_ref[...].astype(jnp.float32)).astype(o_ref.dtype)


@functools.partial(jax.jit,
                   static_argnames=("tm", "tk", "cast_to_bf16", "approximate_gelu", "vmem_limit"))
def _feed_forward_impl(x, w1, b1, w2, b2, *, tm, tk, cast_to_bf16, approximate_gelu, vmem_limit):
    B, S, dim = x.shape
    hidden = w1.shape[1]
    M = B * S
    out_dtype = x.dtype
    compute_dtype = jnp.bfloat16 if (cast_to_bf16 and x.dtype == jnp.float32) else x.dtype

    dim_p = _round_up(dim, 128)
    hid_p = _round_up(_round_up(hidden, 128), tk)
    m_p = _round_up(M, tm)

    def pad2(a, r, c):
        # Skip the pad entirely when already aligned (keeps aligned shapes off the pad path;
        # weight padding could also be hoisted to parameter setup for unaligned models).
        if a.shape == (r, c):
            return a
        return jnp.pad(a, ((0, r - a.shape[0]), (0, c - a.shape[1])))

    x2 = pad2(x.reshape(M, dim).astype(compute_dtype), m_p, dim_p)
    w1p = pad2(w1.astype(compute_dtype), dim_p, hid_p)
    w2p = pad2(w2.astype(compute_dtype), hid_p, dim_p)
    b1p = pad2(b1.reshape(1, hidden), 1, hid_p)   # biases stay in their original dtype
    b2p = pad2(b2.reshape(1, dim), 1, dim_p)

    grid = (m_p // tm, hid_p // tk)

    w_isz = np.dtype(compute_dtype).itemsize
    o_isz = np.dtype(out_dtype).itemsize
    b_isz = np.dtype(b1p.dtype).itemsize
    w_reads = 1 if tk == hid_p else grid[0]       # weight-resident path streams weights once
    cost = pl.CostEstimate(
        flops=4 * m_p * dim_p * hid_p,
        transcendentals=m_p * hid_p,
        bytes_accessed=(x2.size * w_isz + m_p * dim_p * o_isz
                        + w_reads * (w1p.size + w2p.size) * w_isz
                        + w_reads * (b1p.size + b2p.size) * b_isz),
    )

    kernel = functools.partial(_ffn_kernel, approximate_gelu=approximate_gelu)

    out = pl.pallas_call(
        kernel,
        out_shape=jax.ShapeDtypeStruct((m_p, dim_p), out_dtype),
        grid_spec=pltpu.PrefetchScalarGridSpec(
            num_scalar_prefetch=0,
            grid=grid,
            in_specs=[
                pl.BlockSpec((tm, dim_p), lambda i, k: (i, 0)),    # x tile
                pl.BlockSpec((dim_p, tk), lambda i, k: (0, k)),    # W1 hidden-chunk (grid-invariant if tk==hid_p)
                pl.BlockSpec((1, tk), lambda i, k: (0, k)),        # b1 chunk
                pl.BlockSpec((tk, dim_p), lambda i, k: (k, 0)),    # W2 hidden-chunk
                pl.BlockSpec((1, dim_p), lambda i, k: (0, 0)),     # b2
            ],
            out_specs=pl.BlockSpec((tm, dim_p), lambda i, k: (i, 0)),
            scratch_shapes=[pltpu.VMEM((tm, dim_p), jnp.float32)],
        ),
        compiler_params=pltpu.CompilerParams(
            dimension_semantics=("parallel", "arbitrary"),
            vmem_limit_bytes=vmem_limit,
        ),
        cost_estimate=cost,
    )(x2, w1p, b1p, w2p, b2p)

    return out[:M, :dim].reshape(B, S, dim)


def feed_forward(x, w1, b1, w2, b2, *, tm=None, tk=None, cast_to_bf16=False,
                 approximate_gelu=False):
    """x: (B, S, dim). w1: (dim, hidden), b1: (hidden,), w2: (hidden, dim), b2: (dim,)."""
    B, S, dim = x.shape
    hidden = w1.shape[1]
    M = B * S

    compute_dtype = jnp.bfloat16 if (cast_to_bf16 and x.dtype == jnp.float32) else x.dtype
    w_isz = np.dtype(compute_dtype).itemsize
    o_isz = np.dtype(x.dtype).itemsize
    dim_p = _round_up(dim, 128)
    hid_p = _round_up(hidden, 128)

    tm_auto, tk_auto, budget, _ = _select_tiles(M, dim_p, hid_p, w_isz, o_isz)

    if tm is None:
        tm = tm_auto
    else:
        tm = max(16, _round_up(min(tm, _round_up(M, 16)), 16))
    if tk is None:
        tk = tk_auto
    else:
        tk = min(max(128, _round_up(tk, 128)), hid_p)

    vmem_limit = int(min(max(int(_footprint_bytes(tm, tk, dim_p, w_isz, o_isz) * 1.3)
                             + (2 << 20), 32 << 20), budget))

    return _feed_forward_impl(x, w1, b1, w2, b2, tm=tm, tk=tk, cast_to_bf16=cast_to_bf16,
                              approximate_gelu=approximate_gelu, vmem_limit=vmem_limit)


def _init_params(key, dim, hidden):
    """Deterministic init mimicking nn.Linear (uniform in +/- 1/sqrt(fan_in))."""
    k1, k2, k3, k4 = jax.random.split(key, 4)
    lim1 = 1.0 / math.sqrt(dim)
    lim2 = 1.0 / math.sqrt(hidden)
    # Stored as (in, out) so the kernel uses x @ W; equivalent to torch's (out, in).T
    w1 = jax.random.uniform(k1, (dim, hidden), jnp.float32, -lim1, lim1)
    b1 = jax.random.uniform(k2, (hidden,), jnp.float32, -lim1, lim1)
    w2 = jax.random.uniform(k3, (hidden, dim), jnp.float32, -lim2, lim2)
    b2 = jax.random.uniform(k4, (dim,), jnp.float32, -lim2, lim2)
    return w1, b1, w2, b2


def _reference(x, w1, b1, w2, b2):
    B, S, dim = x.shape
    xf = x.reshape(-1, dim).astype(jnp.float32)
    h = xf @ w1.astype(jnp.float32) + b1.astype(jnp.float32)
    h = 0.5 * h * (1.0 + jax.lax.erf(h / math.sqrt(2.0)))
    return (h @ w2.astype(jnp.float32) + b2.astype(jnp.float32)).reshape(B, S, dim)


if __name__ == "__main__":
    key = jax.random.PRNGKey(0)

    # Test 1: aligned small shapes, f32, exact GELU (matches torch.nn.GELU default).
    k1, k2, key = jax.random.split(key, 3)
    B, S, dim, hidden = 2, 8, 32, 64
    x = jax.random.normal(k1, (B, S, dim), dtype=jnp.float32)
    w1, b1, w2, b2 = _init_params(k2, dim, hidden)
    out = jax.block_until_ready(feed_forward(x, w1, b1, w2, b2))
    ref = _reference(x, w1, b1, w2, b2)
    assert out.shape == (B, S, dim)
    assert jnp.allclose(out, ref, atol=1e-4, rtol=1e-4)

    # Test 2: ragged shapes exercising the padding path (M, dim, hidden not lane/tile aligned).
    k3, k4, key = jax.random.split(key, 3)
    B, S, dim, hidden = 2, 10, 48, 96
    x = jax.random.normal(k3, (B, S, dim), dtype=jnp.float32)
    w1, b1, w2, b2 = _init_params(k4, dim, hidden)
    out = jax.block_until_ready(feed_forward(x, w1, b1, w2, b2))
    ref = _reference(x, w1, b1, w2, b2)
    assert out.shape == (B, S, dim)
    assert jnp.allclose(out, ref, atol=1e-4, rtol=1e-4)

    # Test 3: forced streamed-weight path (tk override) with a multi-step hidden reduction.
    k5, k6, key = jax.random.split(key, 3)
    B, S, dim, hidden = 2, 16, 64, 384
    x = jax.random.normal(k5, (B, S, dim), dtype=jnp.float32)
    w1, b1, w2, b2 = _init_params(k6, dim, hidden)
    out = jax.block_until_ready(feed_forward(x, w1, b1, w2, b2, tk=128))
    ref = _reference(x, w1, b1, w2, b2)
    assert jnp.allclose(out, ref, atol=1e-4, rtol=1e-4)

    # Test 4: bf16 inputs/weights, native bf16 MXU operands with f32 accumulation.
    k7, k8, key = jax.random.split(key, 3)
    B, S, dim, hidden = 2, 64, 128, 256
    x = jax.random.normal(k7, (B, S, dim), dtype=jnp.float32)
    w1, b1, w2, b2 = _init_params(k8, dim, hidden)
    xb, w1b, b1b, w2b, b2b = (a.astype(jnp.bfloat16) for a in (x, w1, b1, w2, b2))
    out = jax.block_until_ready(feed_forward(xb, w1b, b1b, w2b, b2b))
    ref = _reference(xb, w1b, b1b, w2b, b2b)
    assert out.dtype == jnp.bfloat16
    assert jnp.allclose(out.astype(jnp.float32), ref, atol=5e-2, rtol=5e-2)

    # Test 5: opt-in bf16 cast of f32 inputs + tanh-approximate GELU (fast path, looser numerics).
    k9, k10, key = jax.random.split(key, 3)
    B, S, dim, hidden = 2, 8, 32, 64
    x = jax.random.normal(k9, (B, S, dim), dtype=jnp.float32)
    w1, b1, w2, b2 = _init_params(k10, dim, hidden)
    out = jax.block_until_ready(
        feed_forward(x, w1, b1, w2, b2, cast_to_bf16=True, approximate_gelu=True))
    ref = _reference(x, w1, b1, w2, b2)
    assert jnp.allclose(out, ref, atol=5e-2, rtol=5e-2)

    print("KERNEL_OK")
</pallas_src>

<mosaic_0001>
module attributes {stable_mosaic.version = 11 : i64} {
  func.func @_ffn_kernel(%arg0: i32, %arg1: i32, %arg2: memref<16x128xf32, #tpu.memory_space<vmem>>, %arg3: memref<128x128xf32, #tpu.memory_space<vmem>>, %arg4: memref<1x128xf32, #tpu.memory_space<vmem>>, %arg5: memref<128x128xf32, #tpu.memory_space<vmem>>, %arg6: memref<1x128xf32, #tpu.memory_space<vmem>>, %arg7: memref<16x128xf32, #tpu.memory_space<vmem>>, %arg8: memref<16x128xf32, #tpu.memory_space<vmem>>) attributes {dimension_semantics = [#tpu.dimension_semantics<parallel>, #tpu.dimension_semantics<arbitrary>], iteration_bounds = array<i64: 1, 1>, scalar_prefetch = 0 : i64, scratch_operands = 1 : i64, tpu.core_type = #tpu.core_type<tc>, window_params = [{transform_indices = @transform_0, window_bounds = array<i64: 16, 128>}, {transform_indices = @transform_1, window_bounds = array<i64: 128, 128>}, {transform_indices = @transform_2, window_bounds = array<i64: 1, 128>}, {transform_indices = @transform_3, window_bounds = array<i64: 128, 128>}, {pipeline_mode = #tpu.pipeline_mode<synchronous>, transform_indices = @transform_4, window_bounds = array<i64: 1, 128>}, {transform_indices = @transform_5, window_bounds = array<i64: 16, 128>}]} {
    %c0_i32 = arith.constant 0 : i32
    %0 = arith.cmpi eq, %arg1, %c0_i32 : i32
    %1 = arith.extui %0 : i1 to i32
    %c0_i32_0 = arith.constant 0 : i32
    %2 = arith.cmpi ne, %1, %c0_i32_0 : i32
    scf.if %2 {
      %cst_18 = arith.constant 0.000000e+00 : f32
      %25 = vector.broadcast %cst_18 : f32 to vector<16x128xf32>
      %c0_19 = arith.constant 0 : index
      %c0_20 = arith.constant 0 : index
      %26 = vector.load %arg8[%c0_19, %c0_20] : memref<16x128xf32, #tpu.memory_space<vmem>>, vector<16x128xf32>
      tpu.vector_store %arg8[%c0_19, %c0_20], %25 {strides = array<i32>} : memref<16x128xf32, #tpu.memory_space<vmem>>, vector<16x128xf32>,
    } else {
    }
    %c0 = arith.constant 0 : index
    %c0_1 = arith.constant 0 : index
    %3 = vector.load %arg2[%c0, %c0_1] : memref<16x128xf32, #tpu.memory_space<vmem>>, vector<16x128xf32>
    %c0_2 = arith.constant 0 : index
    %c0_3 = arith.constant 0 : index
    %4 = vector.load %arg3[%c0_2, %c0_3] : memref<128x128xf32, #tpu.memory_space<vmem>>, vector<128x128xf32>
    %cst = arith.constant dense<0.000000e+00> : vector<16x128xf32>
    %5 = tpu.matmul %3, %4, %cst {dimension_numbers = #tpu.dot_dimension_numbers<[1], [0], [0], [1], [0, 0, 1, 1], [], []>} : vector<16x128xf32>, vector<128x128xf32>, vector<16x128xf32> -> vector<16x128xf32>
    %c0_4 = arith.constant 0 : index
    %c0_5 = arith.constant 0 : index
    %6 = vector.load %arg4[%c0_4, %c0_5] : memref<1x128xf32, #tpu.memory_space<vmem>>, vector<1x128xf32>
    %7 = vector.broadcast %6 : vector<1x128xf32> to vector<16x128xf32>
    %8 = arith.addf %5, %7 : vector<16x128xf32>
    %cst_6 = arith.constant 5.000000e-01 : f32
    %9 = vector.broadcast %cst_6 : f32 to vector<16x128xf32>
    %10 = arith.mulf %9, %8 : vector<16x128xf32>
    %cst_7 = arith.constant 0.707106769 : f32
    %11 = vector.broadcast %cst_7 : f32 to vector<16x128xf32>
    %12 = arith.mulf %8, %11 : vector<16x128xf32>
    %13 = math.erf %12 : vector<16x128xf32>
    %cst_8 = arith.constant 1.000000e+00 : f32
    %14 = vector.broadcast %cst_8 : f32 to vector<16x128xf32>
    %15 = arith.addf %14, %13 : vector<16x128xf32>
    %16 = arith.mulf %10, %15 : vector<16x128xf32>
    %c0_9 = arith.constant 0 : index
    %c0_10 = arith.constant 0 : index
    %17 = vector.load %arg8[%c0_9, %c0_10] : memref<16x128xf32, #tpu.memory_space<vmem>>, vector<16x128xf32>
    %c0_11 = arith.constant 0 : index
    %c0_12 = arith.constant 0 : index
    %18 = vector.load %arg5[%c0_11, %c0_12] : memref<128x128xf32, #tpu.memory_space<vmem>>, vector<128x128xf32>
    %cst_13 = arith.constant dense<0.000000e+00> : vector<16x128xf32>
    %19 = tpu.matmul %16, %18, %cst_13 {dimension_numbers = #tpu.dot_dimension_numbers<[1], [0], [0], [1], [0, 0, 1, 1], [], []>} : vector<16x128xf32>, vector<128x128xf32>, vector<16x128xf32> -> vector<16x128xf32>
    %20 = arith.addf %17, %19 : vector<16x128xf32>
    %c0_14 = arith.constant 0 : index
    %c0_15 = arith.constant 0 : index
    %21 = vector.load %arg8[%c0_14, %c0_15] : memref<16x128xf32, #tpu.memory_space<vmem>>, vector<16x128xf32>
    tpu.vector_store %arg8[%c0_14, %c0_15], %20 {strides = array<i32>} : memref<16x128xf32, #tpu.memory_space<vmem>>, vector<16x128xf32>,
    %c0_i32_16 = arith.constant 0 : i32
    %22 = arith.cmpi eq, %arg1, %c0_i32_16 : i32
    %23 = arith.extui %22 : i1 to i32
    %c0_i32_17 = arith.constant 0 : i32
    %24 = arith.cmpi ne, %23, %c0_i32_17 : i32
    scf.if %24 {
      %c0_18 = arith.constant 0 : index
      %c0_19 = arith.constant 0 : index
      %25 = vector.load %arg8[%c0_18, %c0_19] : memref<16x128xf32, #tpu.memory_space<vmem>>, vector<16x128xf32>
      %c0_20 = arith.constant 0 : index
      %c0_21 = arith.constant 0 : index
      %26 = vector.load %arg6[%c0_20, %c0_21] : memref<1x128xf32, #tpu.memory_space<vmem>>, vector<1x128xf32>
      %27 = vector.broadcast %26 : vector<1x128xf32> to vector<16x128xf32>
      %28 = arith.addf %25, %27 : vector<16x128xf32>
      %c0_22 = arith.constant 0 : index
      %c0_23 = arith.constant 0 : index
      %29 = vector.load %arg7[%c0_22, %c0_23] : memref<16x128xf32, #tpu.memory_space<vmem>>, vector<16x128xf32>
      tpu.vector_store %arg7[%c0_22, %c0_23], %28 {strides = array<i32>} : memref<16x128xf32, #tpu.memory_space<vmem>>, vector<16x128xf32>,
    } else {
    }
    return
  }
  func.func @transform_0(%arg0: i32, %arg1: i32) -> (i32, i32) {
    %c0_i32 = arith.constant 0 : i32
    %c0_i32_0 = arith.constant 0 : i32
    return %arg0, %c0_i32 : i32, i32
  }
  func.func @transform_1(%arg0: i32, %arg1: i32) -> (i32, i32) {
    %c0_i32 = arith.constant 0 : i32
    %c0_i32_0 = arith.constant 0 : i32
    return %c0_i32, %arg1 : i32, i32
  }
  func.func @transform_2(%arg0: i32, %arg1: i32) -> (i32, i32) {
    %c0_i32 = arith.constant 0 : i32
    %c0_i32_0 = arith.constant 0 : i32
    return %c0_i32, %arg1 : i32, i32
  }
  func.func @transform_3(%arg0: i32, %arg1: i32) -> (i32, i32) {
    %c0_i32 = arith.constant 0 : i32
    %c0_i32_0 = arith.constant 0 : i32
    return %arg1, %c0_i32 : i32, i32
  }
  func.func @transform_4(%arg0: i32, %arg1: i32) -> (i32, i32) {
    %c0_i32 = arith.constant 0 : i32
    %c0_i32_0 = arith.constant 0 : i32
    %c0_i32_1 = arith.constant 0 : i32
    return %c0_i32, %c0_i32_0 : i32, i32
  }
  func.func @transform_5(%arg0: i32, %arg1: i32) -> (i32, i32) {
    %c0_i32 = arith.constant 0 : i32
    %c0_i32_0 = arith.constant 0 : i32
    return %arg0, %c0_i32 : i32, i32
  }
}

</mosaic_0001>

<bundles_post_ra>
// kernel: _feed_forward_impl.1
= control target key start
LH: loop header
LB: loop body
LE: loop exit
PB: predicated region body
PF: predicated region fallthrough
CT: control target
= control target key end

     0   :  { %s509_s1 = inlined_call_operand.vmem [shape: f32[128,128], index: 1, kind: input, shape index: {}]   ;;  %s510_s0 = inlined_call_operand.vmem [shape: f32[16,128], index: 0, kind: input, shape index: {}]   ;;  %s511_s3 = inlined_call_operand.vmem [shape: f32[128,128], index: 3, kind: input, shape index: {}]   ;;  %s512_s2 = inlined_call_operand.vmem [shape: f32[1,128], index: 2, kind: input, shape index: {}]   ;;  %s513_s4 = inlined_call_operand.vmem [shape: f32[1,128], index: 4, kind: input, shape index: {}]   ;;  %s514_s5 = inlined_call_operand.vmem [shape: f32[16,128], index: 5, kind: output, shape index: {}]  }
   0x1   :  { %v43_v0 = vld [vmem:[%s509_s1 + $0x78] sm:$0xff]  ;;  %v42_v1 = vld [vmem:[%s509_s1 + $0x70] sm:$0xff]  ;;  %v41_v2 = vld [vmem:[%s509_s1 + $0x68] sm:$0xff] }
   0x2   :  { %291 = vmatprep.subr.mxu0 %v43_v0  ;;  %v40_v3 = vld [vmem:[%s509_s1 + $0x60] sm:$0xff]  ;;  %v39_v5 = vld [vmem:[%s509_s1 + $0x58] sm:$0xff]  ;;  %v152_v7 = vld [vmem:[%s511_s3 + $0x70] sm:$0xff] }
   0x3   :  { %292 = vmatpush3.msra.mxu0 %v43_v0  ;;  %v26_v4 = vld [vmem:[%s510_s0] sm:$0xff]  ;;  %v153_v6 = vld [vmem:[%s511_s3 + $0x78] sm:$0xff]  ;;  %v38_v8 = vld [vmem:[%s509_s1 + $0x50] sm:$0xff] }
   0x4   :  { %293 = vmatprep.subr.mxu0 %v42_v1  ;;  %323 = vmatprep.mubr.f32.mxu0 %v26_v4  ;;  %v151_v9 = vld [vmem:[%s511_s3 + $0x68] sm:$0xff]  ;;  %v36_v11 = vld [vmem:[%s509_s1 + $0x40] sm:$0xff]  ;;  %v35_v12 = vld [vmem:[%s509_s1 + $0x38] sm:$0xff] }
   0x5   :  { %294 = vmatpush3.msra.mxu0 %v42_v1  ;;  %326 = vmatprep.subr.mxu1 %v153_v6  ;;  %v37_v10 = vld [vmem:[%s509_s1 + $0x48] sm:$0xff]  ;;  %v34_v13 = vld [vmem:[%s509_s1 + $0x30] sm:$0xff]  ;;  %v32_v15 = vld [vmem:[%s509_s1 + $0x20] sm:$0xff] }
   0x6   :  { %295 = vmatprep.subr.mxu0 %v41_v2  ;;  %327 = vmatpush3.msra.mxu1 %v153_v6  ;;  %v33_v14 = vld [vmem:[%s509_s1 + $0x28] sm:$0xff]  ;;  %v31_v16 = vld [vmem:[%s509_s1 + $0x18] sm:$0xff]  ;;  %v30_v17 = vld [vmem:[%s509_s1 + $0x10] sm:$0xff] }
   0x7   :  { %296 = vmatpush3.msra.mxu0 %v41_v2  ;;  %328 = vmatprep.subr.mxu1 %v152_v7  ;;  %v29_v18 = vld [vmem:[%s509_s1 + $0x8] sm:$0xff]  ;;  %v28_v19 = vld [vmem:[%s509_s1] sm:$0xff]  ;;  %v149_v22 = vld [vmem:[%s511_s3 + $0x58] sm:$0xff] }
   0x8   :  { %297 = vmatprep.subr.mxu0 %v40_v3  ;;  %329 = vmatpush3.msra.mxu1 %v152_v7  ;;  %v27_v20 = vld [vmem:[%s510_s0 + $0x8] sm:$0xff]  ;;  %v150_v21 = vld [vmem:[%s511_s3 + $0x60] sm:$0xff]  ;;  %v148_v23 = vld [vmem:[%s511_s3 + $0x50] sm:$0xff] }
   0x9   :  { %298 = vmatpush3.msra.mxu0 %v40_v3  ;;  %330 = vmatprep.subr.mxu1 %v151_v9  ;;  %v147_v24 = vld [vmem:[%s511_s3 + $0x48] sm:$0xff]  ;;  %v146_v25 = vld [vmem:[%s511_s3 + $0x40] sm:$0xff]  ;;  %v145_v26 = vld [vmem:[%s511_s3 + $0x38] sm:$0xff] }
   0xa   :  { %299 = vmatprep.subr.mxu0 %v39_v5  ;;  %331 = vmatpush3.msra.mxu1 %v151_v9  ;;  %v144_v27 = vld [vmem:[%s511_s3 + $0x30] sm:$0xff]  ;;  %v143_v28 = vld [vmem:[%s511_s3 + $0x28] sm:$0xff]  ;;  %v142_v29 = vld [vmem:[%s511_s3 + $0x20] sm:$0xff] }
   0xb   :  { %300 = vmatpush3.msra.mxu0 %v39_v5  ;;  %332 = vmatprep.subr.mxu1 %v150_v21  ;;  %v141_v30 = vld [vmem:[%s511_s3 + $0x18] sm:$0xff]  ;;  %v140_v31 = vld [vmem:[%s511_s3 + $0x10] sm:$0xff]  ;;  %v139_v32 = vld [vmem:[%s511_s3 + $0x8] sm:$0xff] }
   0xc   :  { %301 = vmatprep.subr.mxu0 %v38_v8  ;;  %333 = vmatpush3.msra.mxu1 %v150_v21  ;;  %v138_v33 = vld [vmem:[%s511_s3] sm:$0xff] }
   0xd   :  { %302 = vmatpush3.msra.mxu0 %v38_v8  ;;  %334 = vmatprep.subr.mxu1 %v149_v22  ;;  %v253_v34 = vld [vmem:[%s512_s2] ss:$0 sm:$0xff] }
   0xe   :  { %303 = vmatprep.subr.mxu0 %v37_v10  ;;  %335 = vmatpush3.msra.mxu1 %v149_v22  ;;  %v254_v49 = vld [vmem:[%s513_s4] ss:$0 sm:$0xff] }
   0xf   :  { %304 = vmatpush3.msra.mxu0 %v37_v10  ;;  %336 = vmatprep.subr.mxu1 %v148_v23 }
  0x10   :  { %305 = vmatprep.subr.mxu0 %v36_v11  ;;  %337 = vmatpush3.msra.mxu1 %v148_v23 }
  0x11   :  { %306 = vmatpush3.msra.mxu0 %v36_v11  ;;  %338 = vmatprep.subr.mxu1 %v147_v24 }
  0x12   :  { %307 = vmatprep.subr.mxu0 %v35_v12  ;;  %339 = vmatpush3.msra.mxu1 %v147_v24 }
  0x13   :  { %308 = vmatpush3.msra.mxu0 %v35_v12  ;;  %340 = vmatprep.subr.mxu1 %v146_v25 }
  0x14   :  { %309 = vmatprep.subr.mxu0 %v34_v13  ;;  %341 = vmatpush3.msra.mxu1 %v146_v25 }
  0x15   :  { %310 = vmatpush3.msra.mxu0 %v34_v13  ;;  %342 = vmatprep.subr.mxu1 %v145_v26 }
  0x16   :  { %311 = vmatprep.subr.mxu0 %v33_v14  ;;  %343 = vmatpush3.msra.mxu1 %v145_v26 }
  0x17   :  { %312 = vmatpush3.msra.mxu0 %v33_v14  ;;  %344 = vmatprep.subr.mxu1 %v144_v27 }
  0x18   :  { %313 = vmatprep.subr.mxu0 %v32_v15  ;;  %345 = vmatpush3.msra.mxu1 %v144_v27 }
  0x19   :  { %314 = vmatpush3.msra.mxu0 %v32_v15  ;;  %346 = vmatprep.subr.mxu1 %v143_v28 }
  0x1a   :  { %315 = vmatprep.subr.mxu0 %v31_v16  ;;  %347 = vmatpush3.msra.mxu1 %v143_v28 }
  0x1b   :  { %316 = vmatpush3.msra.mxu0 %v31_v16  ;;  %348 = vmatprep.subr.mxu1 %v142_v29 }
  0x1c   :  { %317 = vmatprep.subr.mxu0 %v30_v17  ;;  %349 = vmatpush3.msra.mxu1 %v142_v29 }
  0x1d   :  { %318 = vmatpush3.msra.mxu0 %v30_v17  ;;  %350 = vmatprep.subr.mxu1 %v141_v30 }
  0x1e   :  { %319 = vmatprep.subr.mxu0 %v29_v18  ;;  %351 = vmatpush3.msra.mxu1 %v141_v30 }
  0x1f   :  { %320 = vmatpush3.msra.mxu0 %v29_v18  ;;  %352 = vmatprep.subr.mxu1 %v140_v31 }
  0x20   :  { %321 = vmatprep.subr.mxu0 %v28_v19  ;;  %353 = vmatpush3.msra.mxu1 %v140_v31 }
  0x21   :  { %322 = vmatpush3.msra.mxu0 %v28_v19  ;;  %354 = vmatprep.subr.mxu1 %v139_v32 }
  0x22   :  { %324 = vmatmul.mubr.f32.vlgmr.msra.gmra.mxu0 %v27_v20  ;;  %355 = vmatpush3.msra.mxu1 %v139_v32 }
  0x23   :  { %356 = vmatprep.subr.mxu1 %v138_v33 }
  0x24   :  { %357 = vmatpush3.msra.mxu1 %v138_v33 }
  0xe2   :  { %v325_v35 = vpop.f32.mrf.mxu0 }
  0xe3   :  { %v123_v36 = vadd.f32 %v325_v35, %v253_v34 }
  0xe4   :  { %v117_v37 = vpop.f32.mrf.mxu0 }
  0xe5   :  { %v129_v38 = vmul.f32 0.70710677, %v123_v36  ;;  %v118_v39 = vadd.f32 %v253_v34, %v117_v37  ;;  %v127_v46 = vmul.f32 0.5, %v123_v36 }
  0xe7   :  { %361 = verf.f32 %v129_v38  ;;  %v128_v40 = vmul.f32 0.70710677, %v118_v39  ;;  %v126_v44 = vmul.f32 0.5, %v118_v39 }
  0xe9   :  { %363 = verf.f32 %v128_v40 }
  0xf4   :  { %v362_v41 = vpop.eup %361 }
  0xf5   :  { %v133_v43 = vadd.f32 1.0, %v362_v41 }
  0xf6   :  { %v364_v42 = vpop.eup %363 }
  0xf7   :  { %v132_v45 = vadd.f32 1.0, %v364_v42  ;;  %v135_v48 = vmul.f32 %v133_v43, %v127_v46 }
  0xf9   :  { %v134_v47 = vmul.f32 %v132_v45, %v126_v44 }
  0xfb   :  { %358 = vmatprep.mubr.f32.mxu1 %v134_v47 }
  0xfc   :  { %359 = vmatmul.mubr.f32.vlgmr.msra.gmra.mxu1 %v135_v48 }
 0x1bc   :  { %v360_v50 = vpop.f32.mrf.mxu1 }
 0x1bd   :  { %v246_v51 = vadd.f32 %v360_v50, %v254_v49 }
 0x1be   :  { %v220_v52 = vpop.f32.mrf.mxu1 }
 0x1bf   :  { %248 = vst [vmem:[%s514_s5 + $0x8] sm:$0xff] %v246_v51  ;;  %v245_v53 = vadd.f32 %v254_v49, %v220_v52 }
 0x1c1   :  { %247 = vst [vmem:[%s514_s5] sm:$0xff] %v245_v53 }

</bundles_post_ra>
